<compile_context>
chip_gen: v7x
topology: tpu7x:2x2x1
jax: 0.10.0
libtpu: 0.0.40
codegen_flags: <defaults>
</compile_context>

<pallas_src>
import functools

import jax
import jax.numpy as jnp
from jax.experimental import pallas as pl
from jax.experimental.pallas import tpu as pltpu

BN_EPS = 1e-5
LANE = 128


# --------------------------------------------------------------------------- kernels
def _layer1_kernel(a_ref, z_ref, scale_ref, b1_ref, w2_ref, out_ref, acc_ref,
                   *, tk, z_resident):
    """acc += A01_tile @ Z1_tile; epilogue: d^-1/2 row scale + BN-folded bias + ReLU,
    then the fused layer-2 transform (.) @ W2, pre-scaled by d^-1/2 for layer 2."""
    k = pl.program_id(1)

    @pl.when(k == 0)
    def _():
        acc_ref[...] = jnp.zeros_like(acc_ref)

    a = a_ref[...].astype(jnp.float32)               # int8 -> f32 (VPU, hidden under DMA)
    if z_resident:
        start = pl.multiple_of(k * tk, LANE)
        z = z_ref[pl.ds(start, tk), :]               # slice the VMEM-resident Z
    else:
        z = z_ref[...]
    acc_ref[...] += jnp.dot(a, z.astype(jnp.float32),
                            preferred_element_type=jnp.float32)

    @pl.when(k == pl.num_programs(1) - 1)
    def _():
        scale = scale_ref[...]                       # (tm, 1) f32 : d_i^-1/2
        h = acc_ref[...] * scale + b1_ref[...]       # conv1 output + folded BatchNorm1d
        h = jnp.maximum(h, 0.0)                      # ReLU  (dropout = identity, eval)
        z2 = jnp.dot(h, w2_ref[...].astype(jnp.float32),
                     preferred_element_type=jnp.float32) * scale
        out_ref[...] = z2.astype(out_ref.dtype)      # already the scaled Z of layer 2


def _layer2_kernel(a_ref, z_ref, scale_ref, b2_ref, out_ref, *, tk, z_resident):
    """f32 output block is resident across k and used directly as the accumulator."""
    k = pl.program_id(1)

    @pl.when(k == 0)
    def _():
        out_ref[...] = jnp.zeros_like(out_ref)

    a = a_ref[...].astype(jnp.float32)
    if z_resident:
        start = pl.multiple_of(k * tk, LANE)
        z = z_ref[pl.ds(start, tk), :]
    else:
        z = z_ref[...]
    out_ref[...] += jnp.dot(a, z.astype(jnp.float32),
                            preferred_element_type=jnp.float32)

    @pl.when(k == pl.num_programs(1) - 1)
    def _():
        out_ref[...] = out_ref[...] * scale_ref[...] + b2_ref[...]


# --------------------------------------------------------------------------- wrappers
def _compiler_params():
    return pltpu.CompilerParams(
        dimension_semantics=("parallel", "arbitrary"),
        vmem_limit_bytes=32 * 1024 * 1024,   # safe on v5e/v6e (128 MiB) and v7x (64 MiB)
    )


def _z_spec(n_pad, tk, width, z_resident):
    if z_resident:
        return pl.BlockSpec((n_pad, width), lambda i, k: (0, 0))   # DMA'd once
    return pl.BlockSpec((tk, width), lambda i, k: (k, 0))          # streamed per row tile


def _layer1_call(a_p, z1_p, scale_p, b1_p, w2_p, *, tm, tk, z_resident):
    n_pad = a_p.shape[0]
    hid_p = z1_p.shape[1]
    cls_p = w2_p.shape[1]
    grid = (n_pad // tm, n_pad // tk)
    return pl.pallas_call(
        functools.partial(_layer1_kernel, tk=tk, z_resident=z_resident),
        out_shape=jax.ShapeDtypeStruct((n_pad, cls_p), jnp.bfloat16),
        grid_spec=pltpu.PrefetchScalarGridSpec(
            num_scalar_prefetch=0,
            grid=grid,
            in_specs=[
                pl.BlockSpec((tm, tk), lambda i, k: (i, k)),         # A01 tile (int8)
                _z_spec(n_pad, tk, hid_p, z_resident),               # Z1 (bf16)
                pl.BlockSpec((tm, 1), lambda i, k: (i, 0)),          # d^-1/2 row scale
                pl.BlockSpec((1, hid_p), lambda i, k: (0, 0)),       # BN-folded bias
                pl.BlockSpec((hid_p, cls_p), lambda i, k: (0, 0)),   # W2 (fused transform)
            ],
            out_specs=pl.BlockSpec((tm, cls_p), lambda i, k: (i, 0)),
            scratch_shapes=[pltpu.VMEM((tm, hid_p), jnp.float32)],
        ),
        compiler_params=_compiler_params(),
    )(a_p, z1_p, scale_p, b1_p, w2_p)


def _layer2_call(a_p, z2_p, scale_p, b2_p, *, tm, tk, z_resident):
    n_pad = a_p.shape[0]
    cls_p = z2_p.shape[1]
    grid = (n_pad // tm, n_pad // tk)
    return pl.pallas_call(
        functools.partial(_layer2_kernel, tk=tk, z_resident=z_resident),
        out_shape=jax.ShapeDtypeStruct((n_pad, cls_p), jnp.float32),
        grid_spec=pltpu.PrefetchScalarGridSpec(
            num_scalar_prefetch=0,
            grid=grid,
            in_specs=[
                pl.BlockSpec((tm, tk), lambda i, k: (i, k)),         # A01 tile (int8)
                _z_spec(n_pad, tk, cls_p, z_resident),               # Z2 (bf16, from layer 1)
                pl.BlockSpec((tm, 1), lambda i, k: (i, 0)),          # d^-1/2 row scale
                pl.BlockSpec((1, cls_p), lambda i, k: (0, 0)),       # bias b2
            ],
            out_specs=pl.BlockSpec((tm, cls_p), lambda i, k: (i, 0)),
        ),
        compiler_params=_compiler_params(),
    )(a_p, z2_p, scale_p, b2_p)


# --------------------------------------------------------------------------- forward
def _round_up(v, m):
    return ((v + m - 1) // m) * m


def _pad2d(x, rows, cols):
    return jnp.pad(x, ((0, rows - x.shape[0]), (0, cols - x.shape[1])))


def _pick_tiles(n_pad, tile):
    """Big tiles (<=512); keep >= 2 row tiles when possible so v7x megacore splits."""
    tk = tile if tile is not None else min(512, n_pad)
    n_pad = _round_up(n_pad, tk)
    tm = tk
    if n_pad // tm < 2 and tm >= 2 * LANE and tm % (2 * LANE) == 0:
        tm //= 2
    return tm, tk, n_pad


def gcn_forward(x, edge_index, params, *, tile=None,
                max_resident_z_bytes=8 * 1024 * 1024):
    """x: (N, F) float32, edge_index: (2, E) int32. Returns logits (N, num_classes)."""
    n, f = x.shape
    hidden = params["w1"].shape[1]
    n_cls = params["w2"].shape[1]

    # ---- static tiling / padding decisions ----
    n_pad = _round_up(n, LANE)
    tm, tk, n_pad = _pick_tiles(n_pad, tile)
    hid_p = _round_up(hidden, LANE)
    cls_p = _round_up(n_cls, LANE)
    # keep Z resident in VMEM unless it would blow the budget (v7x has only 64 MiB)
    z_resident = n_pad * max(hid_p, cls_p) * 2 <= max_resident_z_bytes

    # ---- binary adjacency (A + I) in int8, built directly at padded shape ----
    src, dst = edge_index[0], edge_index[1]
    adj = jnp.zeros((n_pad, n_pad), jnp.int8)
    adj = adj.at[dst, src].set(1)
    diag = jnp.arange(n, dtype=jnp.int32)
    adj = adj.at[diag, diag].set(1)                       # self loops on real nodes only
    deg = jnp.sum(adj, axis=1, dtype=jnp.float32)         # padded rows -> 0
    d_inv_sqrt = jnp.where(deg > 0, jax.lax.rsqrt(deg), 0.0)
    scale_p = d_inv_sqrt.reshape(n_pad, 1)                # f32 column for the epilogues

    # ---- fold eval-mode BatchNorm1d into conv1 weight / bias ----
    s = params["gamma"] * jax.lax.rsqrt(params["running_var"] + BN_EPS)
    w1f = params["w1"] * s[None, :]
    b1f = (params["b1"] - params["running_mean"]) * s + params["beta"]

    w1_p = _pad2d(w1f, f, hid_p)
    b1_p = _pad2d(b1f.reshape(1, hidden), 1, hid_p)
    w2_p = _pad2d(params["w2"], hid_p, cls_p)             # kept f32 (tiny, exact)
    b2_p = _pad2d(params["b2"].reshape(1, n_cls), 1, cls_p)

    # ---- layer-1 feature transform (cheap, XLA); right D^-1/2 folded into the rows ----
    x_p = _pad2d(x, n_pad, f) * scale_p
    z1_p = jnp.dot(x_p, w1_p, preferred_element_type=jnp.float32).astype(jnp.bfloat16)

    # ---- layer 1: aggregation + BN + ReLU + fused H @ W2 (Pallas) ----
    z2_p = _layer1_call(adj, z1_p, scale_p, b1_p, w2_p,
                        tm=tm, tk=tk, z_resident=z_resident)

    # (dropout: identity in eval mode)

    # ---- layer 2: aggregation straight into the f32 output (Pallas) ----
    out_p = _layer2_call(adj, z2_p, scale_p, b2_p,
                         tm=tm, tk=tk, z_resident=z_resident)

    return out_p[:n, :n_cls]


# --------------------------------------------------------------------------- reference
def _dense_a_hat(n, edge_index):
    src, dst = edge_index[0], edge_index[1]
    adj = jnp.zeros((n, n), jnp.float32).at[dst, src].set(1.0)
    diag = jnp.arange(n)
    adj = adj.at[diag, diag].set(1.0)
    deg = jnp.sum(adj, axis=1)
    dis = jnp.where(deg > 0, jax.lax.rsqrt(deg), 0.0)
    return dis[:, None] * adj * dis[None, :]


def _reference(x, edge_index, p):
    a_hat = _dense_a_hat(x.shape[0], edge_index)
    h = a_hat @ (x @ p["w1"]) + p["b1"]
    h = (h - p["running_mean"]) / jnp.sqrt(p["running_var"] + BN_EPS)
    h = h * p["gamma"] + p["beta"]
    h = jnp.maximum(h, 0.0)
    return a_hat @ (h @ p["w2"]) + p["b2"]


# --------------------------------------------------------------------------- test
def _make_case(key, num_nodes, num_feat, hidden, num_classes):
    kx, kw1, kw2, kg, kb, km, kv, ke = jax.random.split(key, 8)
    x = jax.random.normal(kx, (num_nodes, num_feat), jnp.float32)
    # deterministic ring graph (both directions) plus random extra edges
    ring_src = jnp.arange(num_nodes, dtype=jnp.int32)
    ring_dst = (ring_src + 1) % num_nodes
    rand_src = jax.random.randint(ke, (2 * num_nodes,), 0, num_nodes, jnp.int32)
    rand_dst = (rand_src * 7 + 3) % num_nodes
    src = jnp.concatenate([ring_src, ring_dst, rand_src])
    dst = jnp.concatenate([ring_dst, ring_src, rand_dst])
    edge_index = jnp.stack([src, dst], axis=0)
    params = {
        "w1": jax.random.normal(kw1, (num_feat, hidden), jnp.float32) * 0.3,
        "b1": jnp.zeros((hidden,), jnp.float32),
        "w2": jax.random.normal(kw2, (hidden, num_classes), jnp.float32) * 0.3,
        "b2": jnp.zeros((num_classes,), jnp.float32),
        "gamma": 1.0 + 0.1 * jax.random.normal(kg, (hidden,), jnp.float32),
        "beta": 0.1 * jax.random.normal(kb, (hidden,), jnp.float32),
        "running_mean": 0.1 * jax.random.normal(km, (hidden,), jnp.float32),
        "running_var": 1.0 + 0.1 * jax.random.uniform(kv, (hidden,), jnp.float32),
    }
    return x, edge_index, params


def _check(num_nodes, seed, **fwd_kwargs):
    num_feat, hidden, num_classes = 8, 32, 4
    x, edge_index, params = _make_case(jax.random.PRNGKey(seed),
                                       num_nodes, num_feat, hidden, num_classes)
    fwd = jax.jit(functools.partial(gcn_forward, **fwd_kwargs))
    out = jax.block_until_ready(fwd(x, edge_index, params))
    ref = _reference(x, edge_index, params)
    assert out.shape == (num_nodes, num_classes)
    assert jnp.allclose(out, ref, atol=5e-2, rtol=5e-2), (
        f"mismatch vs JAX reference (N={num_nodes}, kwargs={fwd_kwargs})")


if __name__ == "__main__":
    # GCN(num_node_features=8, num_classes=4), hidden=32, N=16 nodes (module shapes).
    _check(16, seed=0)
    # Multi row-tile / multi-k accumulation path (3x3 grid, resident-Z dynamic slices).
    _check(300, seed=1, tile=128)
    # Tiled-Z fallback path (Z re-streamed per row tile).
    _check(300, seed=2, tile=128, max_resident_z_bytes=0)
    print("KERNEL_OK")
</pallas_src>

<mosaic_0001>
module attributes {stable_mosaic.version = 11 : i64} {
  func.func @_layer1_kernel(%arg0: i32, %arg1: i32, %arg2: memref<128x128xi8, #tpu.memory_space<vmem>>, %arg3: memref<128x128xbf16, #tpu.memory_space<vmem>>, %arg4: memref<128x1xf32, #tpu.memory_space<vmem>>, %arg5: memref<1x128xf32, #tpu.memory_space<vmem>>, %arg6: memref<128x128xf32, #tpu.memory_space<vmem>>, %arg7: memref<128x128xbf16, #tpu.memory_space<vmem>>, %arg8: memref<128x128xf32, #tpu.memory_space<vmem>>) attributes {dimension_semantics = [#tpu.dimension_semantics<parallel>, #tpu.dimension_semantics<arbitrary>], iteration_bounds = array<i64: 1, 1>, scalar_prefetch = 0 : i64, scratch_operands = 1 : i64, tpu.core_type = #tpu.core_type<tc>, window_params = [{transform_indices = @transform_0, window_bounds = array<i64: 128, 128>}, {pipeline_mode = #tpu.pipeline_mode<synchronous>, transform_indices = @transform_1, window_bounds = array<i64: 128, 128>}, {transform_indices = @transform_2, window_bounds = array<i64: 128, 1>}, {pipeline_mode = #tpu.pipeline_mode<synchronous>, transform_indices = @transform_3, window_bounds = array<i64: 1, 128>}, {pipeline_mode = #tpu.pipeline_mode<synchronous>, transform_indices = @transform_4, window_bounds = array<i64: 128, 128>}, {transform_indices = @transform_5, window_bounds = array<i64: 128, 128>}]} {
    %c0_i32 = arith.constant 0 : i32
    %0 = arith.cmpi eq, %arg1, %c0_i32 : i32
    %1 = arith.extui %0 : i1 to i32
    %c0_i32_0 = arith.constant 0 : i32
    %2 = arith.cmpi ne, %1, %c0_i32_0 : i32
    scf.if %2 {
      %cst_9 = arith.constant 0.000000e+00 : f32
      %17 = vector.broadcast %cst_9 : f32 to vector<128x128xf32>
      %c0_10 = arith.constant 0 : index
      %c0_11 = arith.constant 0 : index
      %18 = vector.load %arg8[%c0_10, %c0_11] : memref<128x128xf32, #tpu.memory_space<vmem>>, vector<128x128xf32>
      tpu.vector_store %arg8[%c0_10, %c0_11], %17 {strides = array<i32>} : memref<128x128xf32, #tpu.memory_space<vmem>>, vector<128x128xf32>,
    } else {
    }
    %c0 = arith.constant 0 : index
    %c0_1 = arith.constant 0 : index
    %3 = vector.load %arg2[%c0, %c0_1] : memref<128x128xi8, #tpu.memory_space<vmem>>, vector<128x128xi8>
    %4 = arith.sitofp %3 : vector<128x128xi8> to vector<128x128xf32>
    %c128_i32 = arith.constant 128 : i32
    %5 = arith.muli %arg1, %c128_i32 : i32
    %6 = tpu.assume_multiple %5, 128 : i32
    %7 = arith.index_cast %6 : i32 to index
    %c0_2 = arith.constant 0 : index
    %8 = vector.load %arg3[%7, %c0_2] : memref<128x128xbf16, #tpu.memory_space<vmem>>, vector<128x128xbf16>
    %c0_3 = arith.constant 0 : index
    %c0_4 = arith.constant 0 : index
    %9 = vector.load %arg8[%c0_3, %c0_4] : memref<128x128xf32, #tpu.memory_space<vmem>>, vector<128x128xf32>
    %10 = arith.extf %8 : vector<128x128xbf16> to vector<128x128xf32>
    %cst = arith.constant dense<0.000000e+00> : vector<128x128xf32>
    %11 = tpu.matmul %4, %10, %cst {dimension_numbers = #tpu.dot_dimension_numbers<[1], [0], [0], [1], [0, 0, 1, 1], [], []>} : vector<128x128xf32>, vector<128x128xf32>, vector<128x128xf32> -> vector<128x128xf32>
    %12 = arith.addf %9, %11 : vector<128x128xf32>
    %c0_5 = arith.constant 0 : index
    %c0_6 = arith.constant 0 : index
    %13 = vector.load %arg8[%c0_5, %c0_6] : memref<128x128xf32, #tpu.memory_space<vmem>>, vector<128x128xf32>
    tpu.vector_store %arg8[%c0_5, %c0_6], %12 {strides = array<i32>} : memref<128x128xf32, #tpu.memory_space<vmem>>, vector<128x128xf32>,
    %c0_i32_7 = arith.constant 0 : i32
    %14 = arith.cmpi eq, %arg1, %c0_i32_7 : i32
    %15 = arith.extui %14 : i1 to i32
    %c0_i32_8 = arith.constant 0 : i32
    %16 = arith.cmpi ne, %15, %c0_i32_8 : i32
    scf.if %16 {
      %c0_9 = arith.constant 0 : index
      %c0_10 = arith.constant 0 : index
      %17 = vector.load %arg4[%c0_9, %c0_10] : memref<128x1xf32, #tpu.memory_space<vmem>>, vector<128x1xf32>
      %c0_11 = arith.constant 0 : index
      %c0_12 = arith.constant 0 : index
      %18 = vector.load %arg8[%c0_11, %c0_12] : memref<128x128xf32, #tpu.memory_space<vmem>>, vector<128x128xf32>
      %19 = vector.broadcast %17 : vector<128x1xf32> to vector<128x128xf32>
      %20 = arith.mulf %18, %19 : vector<128x128xf32>
      %c0_13 = arith.constant 0 : index
      %c0_14 = arith.constant 0 : index
      %21 = vector.load %arg5[%c0_13, %c0_14] : memref<1x128xf32, #tpu.memory_space<vmem>>, vector<1x128xf32>
      %22 = vector.broadcast %21 : vector<1x128xf32> to vector<128x128xf32>
      %23 = arith.addf %20, %22 : vector<128x128xf32>
      %cst_15 = arith.constant 0.000000e+00 : f32
      %24 = vector.broadcast %cst_15 : f32 to vector<128x128xf32>
      %25 = arith.maximumf %23, %24 : vector<128x128xf32>
      %c0_16 = arith.constant 0 : index
      %c0_17 = arith.constant 0 : index
      %26 = vector.load %arg6[%c0_16, %c0_17] : memref<128x128xf32, #tpu.memory_space<vmem>>, vector<128x128xf32>
      %cst_18 = arith.constant dense<0.000000e+00> : vector<128x128xf32>
      %27 = tpu.matmul %25, %26, %cst_18 {dimension_numbers = #tpu.dot_dimension_numbers<[1], [0], [0], [1], [0, 0, 1, 1], [], []>} : vector<128x128xf32>, vector<128x128xf32>, vector<128x128xf32> -> vector<128x128xf32>
      %28 = vector.broadcast %17 : vector<128x1xf32> to vector<128x128xf32>
      %29 = arith.mulf %27, %28 : vector<128x128xf32>
      %30 = arith.truncf %29 : vector<128x128xf32> to vector<128x128xbf16>
      %c0_19 = arith.constant 0 : index
      %c0_20 = arith.constant 0 : index
      %31 = vector.load %arg7[%c0_19, %c0_20] : memref<128x128xbf16, #tpu.memory_space<vmem>>, vector<128x128xbf16>
      tpu.vector_store %arg7[%c0_19, %c0_20], %30 {strides = array<i32>} : memref<128x128xbf16, #tpu.memory_space<vmem>>, vector<128x128xbf16>,
    } else {
    }
    return
  }
  func.func @transform_0(%arg0: i32, %arg1: i32) -> (i32, i32) {
    %c0_i32 = arith.constant 0 : i32
    return %arg0, %arg1 : i32, i32
  }
  func.func @transform_1(%arg0: i32, %arg1: i32) -> (i32, i32) {
    %c0_i32 = arith.constant 0 : i32
    %c0_i32_0 = arith.constant 0 : i32
    %c0_i32_1 = arith.constant 0 : i32
    return %c0_i32, %c0_i32_0 : i32, i32
  }
  func.func @transform_2(%arg0: i32, %arg1: i32) -> (i32, i32) {
    %c0_i32 = arith.constant 0 : i32
    %c0_i32_0 = arith.constant 0 : i32
    return %arg0, %c0_i32 : i32, i32
  }
  func.func @transform_3(%arg0: i32, %arg1: i32) -> (i32, i32) {
    %c0_i32 = arith.constant 0 : i32
    %c0_i32_0 = arith.constant 0 : i32
    %c0_i32_1 = arith.constant 0 : i32
    return %c0_i32, %c0_i32_0 : i32, i32
  }
  func.func @transform_4(%arg0: i32, %arg1: i32) -> (i32, i32) {
    %c0_i32 = arith.constant 0 : i32
    %c0_i32_0 = arith.constant 0 : i32
    %c0_i32_1 = arith.constant 0 : i32
    return %c0_i32, %c0_i32_0 : i32, i32
  }
  func.func @transform_5(%arg0: i32, %arg1: i32) -> (i32, i32) {
    %c0_i32 = arith.constant 0 : i32
    %c0_i32_0 = arith.constant 0 : i32
    return %arg0, %c0_i32 : i32, i32
  }
}

module attributes {stable_mosaic.version = 11 : i64} {
  func.func @_layer2_kernel(%arg0: i32, %arg1: i32, %arg2: memref<128x128xi8, #tpu.memory_space<vmem>>, %arg3: memref<128x128xbf16, #tpu.memory_space<vmem>>, %arg4: memref<128x1xf32, #tpu.memory_space<vmem>>, %arg5: memref<1x128xf32, #tpu.memory_space<vmem>>, %arg6: memref<128x128xf32, #tpu.memory_space<vmem>>) attributes {dimension_semantics = [#tpu.dimension_semantics<parallel>, #tpu.dimension_semantics<arbitrary>], iteration_bounds = array<i64: 1, 1>, scalar_prefetch = 0 : i64, scratch_operands = 0 : i64, tpu.core_type = #tpu.core_type<tc>, window_params = [{transform_indices = @transform_0, window_bounds = array<i64: 128, 128>}, {pipeline_mode = #tpu.pipeline_mode<synchronous>, transform_indices = @transform_1, window_bounds = array<i64: 128, 128>}, {transform_indices = @transform_2, window_bounds = array<i64: 128, 1>}, {pipeline_mode = #tpu.pipeline_mode<synchronous>, transform_indices = @transform_3, window_bounds = array<i64: 1, 128>}, {transform_indices = @transform_4, window_bounds = array<i64: 128, 128>}]} {
    %c0_i32 = arith.constant 0 : i32
    %0 = arith.cmpi eq, %arg1, %c0_i32 : i32
    %1 = arith.extui %0 : i1 to i32
    %c0_i32_0 = arith.constant 0 : i32
    %2 = arith.cmpi ne, %1, %c0_i32_0 : i32
    scf.if %2 {
      %cst_9 = arith.constant 0.000000e+00 : f32
      %17 = vector.broadcast %cst_9 : f32 to vector<128x128xf32>
      %c0_10 = arith.constant 0 : index
      %c0_11 = arith.constant 0 : index
      %18 = vector.load %arg6[%c0_10, %c0_11] : memref<128x128xf32, #tpu.memory_space<vmem>>, vector<128x128xf32>
      tpu.vector_store %arg6[%c0_10, %c0_11], %17 {strides = array<i32>} : memref<128x128xf32, #tpu.memory_space<vmem>>, vector<128x128xf32>,
    } else {
    }
    %c0 = arith.constant 0 : index
    %c0_1 = arith.constant 0 : index
    %3 = vector.load %arg2[%c0, %c0_1] : memref<128x128xi8, #tpu.memory_space<vmem>>, vector<128x128xi8>
    %4 = arith.sitofp %3 : vector<128x128xi8> to vector<128x128xf32>
    %c128_i32 = arith.constant 128 : i32
    %5 = arith.muli %arg1, %c128_i32 : i32
    %6 = tpu.assume_multiple %5, 128 : i32
    %7 = arith.index_cast %6 : i32 to index
    %c0_2 = arith.constant 0 : index
    %8 = vector.load %arg3[%7, %c0_2] : memref<128x128xbf16, #tpu.memory_space<vmem>>, vector<128x128xbf16>
    %c0_3 = arith.constant 0 : index
    %c0_4 = arith.constant 0 : index
    %9 = vector.load %arg6[%c0_3, %c0_4] : memref<128x128xf32, #tpu.memory_space<vmem>>, vector<128x128xf32>
    %10 = arith.extf %8 : vector<128x128xbf16> to vector<128x128xf32>
    %cst = arith.constant dense<0.000000e+00> : vector<128x128xf32>
    %11 = tpu.matmul %4, %10, %cst {dimension_numbers = #tpu.dot_dimension_numbers<[1], [0], [0], [1], [0, 0, 1, 1], [], []>} : vector<128x128xf32>, vector<128x128xf32>, vector<128x128xf32> -> vector<128x128xf32>
    %12 = arith.addf %9, %11 : vector<128x128xf32>
    %c0_5 = arith.constant 0 : index
    %c0_6 = arith.constant 0 : index
    %13 = vector.load %arg6[%c0_5, %c0_6] : memref<128x128xf32, #tpu.memory_space<vmem>>, vector<128x128xf32>
    tpu.vector_store %arg6[%c0_5, %c0_6], %12 {strides = array<i32>} : memref<128x128xf32, #tpu.memory_space<vmem>>, vector<128x128xf32>,
    %c0_i32_7 = arith.constant 0 : i32
    %14 = arith.cmpi eq, %arg1, %c0_i32_7 : i32
    %15 = arith.extui %14 : i1 to i32
    %c0_i32_8 = arith.constant 0 : i32
    %16 = arith.cmpi ne, %15, %c0_i32_8 : i32
    scf.if %16 {
      %c0_9 = arith.constant 0 : index
      %c0_10 = arith.constant 0 : index
      %17 = vector.load %arg6[%c0_9, %c0_10] : memref<128x128xf32, #tpu.memory_space<vmem>>, vector<128x128xf32>
      %c0_11 = arith.constant 0 : index
      %c0_12 = arith.constant 0 : index
      %18 = vector.load %arg4[%c0_11, %c0_12] : memref<128x1xf32, #tpu.memory_space<vmem>>, vector<128x1xf32>
      %19 = vector.broadcast %18 : vector<128x1xf32> to vector<128x128xf32>
      %20 = arith.mulf %17, %19 : vector<128x128xf32>
      %c0_13 = arith.constant 0 : index
      %c0_14 = arith.constant 0 : index
      %21 = vector.load %arg5[%c0_13, %c0_14] : memref<1x128xf32, #tpu.memory_space<vmem>>, vector<1x128xf32>
      %22 = vector.broadcast %21 : vector<1x128xf32> to vector<128x128xf32>
      %23 = arith.addf %20, %22 : vector<128x128xf32>
      %c0_15 = arith.constant 0 : index
      %c0_16 = arith.constant 0 : index
      %24 = vector.load %arg6[%c0_15, %c0_16] : memref<128x128xf32, #tpu.memory_space<vmem>>, vector<128x128xf32>
      tpu.vector_store %arg6[%c0_15, %c0_16], %23 {strides = array<i32>} : memref<128x128xf32, #tpu.memory_space<vmem>>, vector<128x128xf32>,
    } else {
    }
    return
  }
  func.func @transform_0(%arg0: i32, %arg1: i32) -> (i32, i32) {
    %c0_i32 = arith.constant 0 : i32
    return %arg0, %arg1 : i32, i32
  }
  func.func @transform_1(%arg0: i32, %arg1: i32) -> (i32, i32) {
    %c0_i32 = arith.constant 0 : i32
    %c0_i32_0 = arith.constant 0 : i32
    %c0_i32_1 = arith.constant 0 : i32
    return %c0_i32, %c0_i32_0 : i32, i32
  }
  func.func @transform_2(%arg0: i32, %arg1: i32) -> (i32, i32) {
    %c0_i32 = arith.constant 0 : i32
    %c0_i32_0 = arith.constant 0 : i32
    return %arg0, %c0_i32 : i32, i32
  }
  func.func @transform_3(%arg0: i32, %arg1: i32) -> (i32, i32) {
    %c0_i32 = arith.constant 0 : i32
    %c0_i32_0 = arith.constant 0 : i32
    %c0_i32_1 = arith.constant 0 : i32
    return %c0_i32, %c0_i32_0 : i32, i32
  }
  func.func @transform_4(%arg0: i32, %arg1: i32) -> (i32, i32) {
    %c0_i32 = arith.constant 0 : i32
    %c0_i32_0 = arith.constant 0 : i32
    return %arg0, %c0_i32 : i32, i32
  }
}

</mosaic_0001>

<bundles_post_ra>
// kernel: gcn_forward.3
= control target key start
LH: loop header
LB: loop body
LE: loop exit
PB: predicated region body
PF: predicated region fallthrough
CT: control target
= control target key end

     0   :  { %v710_v2 = vmov 0   ;;  %s889_s1 = inlined_call_operand.vmem [shape: bf16[128,128], index: 1, kind: input, shape index: {}]   ;;  %s890_s0 = inlined_call_operand.vmem [shape: s8[128,128], index: 0, kind: input, shape index: {}]   ;;  %s891_s2 = inlined_call_operand.vmem [shape: f32[128,1], index: 2, kind: input, shape index: {}]   ;;  %s892_s3 = inlined_call_operand.vmem [shape: f32[1,128], index: 3, kind: input, shape index: {}]   ;;  %s893_s4 = inlined_call_operand.vmem [shape: f32[128,128], index: 4, kind: output, shape index: {}]  }
   0x1   :  { %v493_v0 = vld [vmem:[%s889_s1] sm:$0xff]   ;;  %v524_v1 = vld [vmem:[%s889_s1 + $0x8] sm:$0xff]   ;;  %709 = vset.pattern.permute.xlu1 %v710_v2  ;;  %708 = vset.pattern.permute.xlu0 %v710_v2  ;;  %v751_v5 = vld [vmem:[%s890_s0 + $0x10] sm:$0xff]  }
   0x2   :  { %652 = vmatprep.subr.bf16.mxu0 %v493_v0  ;;  %683 = vmatprep.subr.bf16.mxu1 %v493_v0  ;;  %v745_v3 = vld [vmem:[%s890_s0] sm:$0xff]   ;;  %v525_v6 = vld [vmem:[%s889_s1 + $0x10] sm:$0xff]   ;;  %v549_v7 = vunpack.c.0.s8 %v751_v5  ;;  %v337_v12 = vld [vmem:[%s891_s2 + $0x18] sm:$0xff]  ;;  %v550_v28 = vunpack.c.1.s8 %v751_v5  ;;  %v553_v30 = vunpack.c.2.s8 %v751_v5  ;;  %v554_v38 = vunpack.c.3.s8 %v751_v5 }
   0x3   :  { %654 = vmatpush3.bf16.msra.mxu0 %v493_v0  ;;  %691 = vmatpush3.bf16.msra.mxu1 %v493_v0  ;;  %v533_v4 = vunpack.c.0.s8 %v745_v3  ;;  %v336_v8 = vld [vmem:[%s891_s2 + $0x10] sm:$0xff]  ;;  %v334_v9 = vld [vmem:[%s891_s2] sm:$0xff]  ;;  %v335_v13 = vld [vmem:[%s891_s2 + $0x8] sm:$0xff]  ;;  %v534_v27 = vunpack.c.1.s8 %v745_v3  ;;  %v537_v29 = vunpack.c.2.s8 %v745_v3  ;;  %v538_v37 = vunpack.c.3.s8 %v745_v3 }
   0x4   :  { %656 = vmatprep.subr.bf16.mxu0 %v524_v1  ;;  %684 = vmatprep.subr.bf16.mxu1 %v524_v1  ;;  %v77_v11 = vcvt.s32.f32 %v549_v7  ;;  %v526_v14 = vld [vmem:[%s889_s1 + $0x18] sm:$0xff]   ;;  %v339_v15 = vld [vmem:[%s891_s2 + $0x28] sm:$0xff]  ;;  %v338_v16 = vld [vmem:[%s891_s2 + $0x20] sm:$0xff]  ;;  %v78_v36 = vcvt.s32.f32 %v550_v28  ;;  %v79_v40 = vcvt.s32.f32 %v553_v30  ;;  %v80_v46 = vcvt.s32.f32 %v554_v38 }
   0x5   :  { %v69_v10 = vcvt.s32.f32 %v533_v4  ;;  %362 = vperm.xlu1 %709, %v336_v8   ;;  %352 = vperm.xlu0 %708, %v334_v9   ;;  %v527_v17 = vld [vmem:[%s889_s1 + $0x20] sm:$0xff]   ;;  %v341_v18 = vld [vmem:[%s891_s2 + $0x38] sm:$0xff]  ;;  %v340_v19 = vld [vmem:[%s891_s2 + $0x30] sm:$0xff]  ;;  %v70_v35 = vcvt.s32.f32 %v534_v27  ;;  %v71_v39 = vcvt.s32.f32 %v537_v29  ;;  %v72_v45 = vcvt.s32.f32 %v538_v37 }
   0x6   :  { %639 = vmatprep.mubr.f32.mxu1 %v77_v11  ;;  %v528_v20 = vld [vmem:[%s889_s1 + $0x28] sm:$0xff]   ;;  %v342_v22 = vld [vmem:[%s891_s2 + $0x40] sm:$0xff]  ;;  %v529_v23 = vld [vmem:[%s889_s1 + $0x30] sm:$0xff]  }
   0x7   :  { %658 = vmatpush3.bf16.msra.mxu0 %v524_v1  ;;  %692 = vmatpush3.bf16.msra.mxu1 %v524_v1  ;;  %v343_v21 = vld [vmem:[%s891_s2 + $0x48] sm:$0xff]  ;;  %v345_v24 = vld [vmem:[%s891_s2 + $0x58] sm:$0xff]  ;;  %v344_v25 = vld [vmem:[%s891_s2 + $0x50] sm:$0xff] }
   0x8   :  { %660 = vmatprep.subr.bf16.mxu0 %v525_v6  ;;  %685 = vmatprep.subr.bf16.mxu1 %v525_v6  ;;  %v530_v26 = vld [vmem:[%s889_s1 + $0x38] sm:$0xff]   ;;  %v347_v31 = vld [vmem:[%s891_s2 + $0x68] sm:$0xff]  ;;  %v346_v32 = vld [vmem:[%s891_s2 + $0x60] sm:$0xff] }
   0x9   :  { %627 = vmatprep.mubr.f32.mxu0 %v69_v10  ;;  %367 = vperm.xlu1 %709, %v337_v12   ;;  %v700_v33 = vld [vmem:[%s890_s0 + $0x8] sm:$0xff]   ;;  %v704_v34 = vld [vmem:[%s890_s0 + $0x18] sm:$0xff]   ;;  %v348_v44 = vld [vmem:[%s891_s2 + $0x70] sm:$0xff] }
   0xa   :  { %357 = vperm.xlu0 %708, %v335_v13   ;;  %v541_v41 = vunpack.c.0.s8 %v700_v33  ;;  %v557_v42 = vunpack.c.0.s8 %v704_v34  ;;  %v349_v43 = vld [vmem:[%s891_s2 + $0x78] sm:$0xff]  ;;  %v542_v47 = vunpack.c.1.s8 %v700_v33  ;;  %v558_v48 = vunpack.c.1.s8 %v704_v34  ;;  %v491_v13 = vld [vmem:[%s892_s3] ss:$0 sm:$0xff] }
   0xb   :  { %662 = vmatpush3.bf16.msra.mxu0 %v525_v6  ;;  %693 = vmatpush3.bf16.msra.mxu1 %v525_v6  ;;  %v545_v51 = vunpack.c.2.s8 %v700_v33  ;;  %v561_v52 = vunpack.c.2.s8 %v704_v34  ;;  %v546_v55 = vunpack.c.3.s8 %v700_v33  ;;  %v562_v56 = vunpack.c.3.s8 %v704_v34 }
   0xc   :  { %664 = vmatprep.subr.bf16.mxu0 %v526_v14  ;;  %686 = vmatprep.subr.bf16.mxu1 %v526_v14  ;;  %v73_v49 = vcvt.s32.f32 %v541_v41  ;;  %v81_v50 = vcvt.s32.f32 %v557_v42  ;;  %v74_v53 = vcvt.s32.f32 %v542_v47  ;;  %v82_v54 = vcvt.s32.f32 %v558_v48 }
   0xd   :  { %377 = vperm.xlu1 %709, %v339_v15   ;;  %v75_v57 = vcvt.s32.f32 %v545_v51  ;;  %v83_v58 = vcvt.s32.f32 %v561_v52  ;;  %v76_v59 = vcvt.s32.f32 %v546_v55  ;;  %v84_v60 = vcvt.s32.f32 %v562_v56 }
   0xe   :  { %372 = vperm.xlu0 %708, %v338_v16  }
   0xf   :  { %666 = vmatpush3.bf16.msra.mxu0 %v526_v14  ;;  %694 = vmatpush3.bf16.msra.mxu1 %v526_v14 }
  0x10   :  { %668 = vmatprep.subr.bf16.mxu0 %v527_v17  ;;  %687 = vmatprep.subr.bf16.mxu1 %v527_v17 }
  0x11   :  { %387 = vperm.xlu1 %709, %v341_v18  }
  0x12   :  { %382 = vperm.xlu0 %708, %v340_v19  }
  0x13   :  { %670 = vmatpush3.bf16.msra.mxu0 %v527_v17  ;;  %695 = vmatpush3.bf16.msra.mxu1 %v527_v17 }
  0x14   :  { %672 = vmatprep.subr.bf16.mxu0 %v528_v20  ;;  %688 = vmatprep.subr.bf16.mxu1 %v528_v20 }
  0x15   :  { %397 = vperm.xlu1 %709, %v343_v21  }
  0x16   :  { %392 = vperm.xlu0 %708, %v342_v22  }
  0x17   :  { %674 = vmatpush3.bf16.msra.mxu0 %v528_v20  ;;  %696 = vmatpush3.bf16.msra.mxu1 %v528_v20 }
  0x18   :  { %676 = vmatprep.subr.bf16.mxu0 %v529_v23  ;;  %689 = vmatprep.subr.bf16.mxu1 %v529_v23 }
  0x19   :  { %407 = vperm.xlu1 %709, %v345_v24  }
  0x1a   :  { %402 = vperm.xlu0 %708, %v344_v25  }
  0x1b   :  { %678 = vmatpush3.bf16.msra.mxu0 %v529_v23  ;;  %697 = vmatpush3.bf16.msra.mxu1 %v529_v23 }
  0x1c   :  { %680 = vmatprep.subr.bf16.mxu0 %v530_v26  ;;  %690 = vmatprep.subr.bf16.mxu1 %v530_v26 }
  0x1d   :  { %417 = vperm.xlu1 %709, %v347_v31  }
  0x1e   :  { %412 = vperm.xlu0 %708, %v346_v32  }
  0x1f   :  { %682 = vmatpush3.bf16.msra.mxu0 %v530_v26  ;;  %698 = vmatpush3.bf16.msra.mxu1 %v530_v26 }
  0x21   :  { %427 = vperm.xlu1 %709, %v349_v43  }
  0x22   :  { %628 = vmatmul.mubr.f32.vlgmr.msra.gmra.mrb[0].mxu0 %v70_v35  ;;  %640 = vmatmul.mubr.f32.vlgmr.msra.gmra.mrb[0].mxu1 %v78_v36 }
  0x23   :  { %630 = vmatprep.mubr.f32.mxu0 %v71_v39  ;;  %642 = vmatprep.mubr.f32.mxu1 %v79_v40 }
  0x24   :  { %422 = vperm.xlu0 %708, %v348_v44  }
  0x26   :  { %631 = vmatmul.mubr.f32.gmra.mrb[2].mxu0 %v72_v45  ;;  %643 = vmatmul.mubr.f32.gmra.mrb[2].mxu1 %v80_v46 }
  0x27   :  { %633 = vmatprep.mubr.f32.mxu0 %v73_v49  ;;  %645 = vmatprep.mubr.f32.mxu1 %v81_v50 }
  0x2a   :  { %634 = vmatmul.mubr.f32.gmra.mrb[4].mxu0 %v74_v53  ;;  %646 = vmatmul.mubr.f32.gmra.mrb[4].mxu1 %v82_v54 }
  0x2b   :  { %636 = vmatprep.mubr.f32.mxu0 %v75_v57  ;;  %648 = vmatprep.mubr.f32.mxu1 %v83_v58 }
  0x2e   :  { %637 = vmatmul.mubr.f32.gmra.mrb[6].mxu0 %v76_v59  ;;  %649 = vmatmul.mubr.f32.gmra.mrb[6].mxu1 %v84_v60 }
  0x84   :  { %v363_v61 = vpop.permute.xlu1 %362  ;;  %v353_v62 = vpop.permute.xlu0 %352 }
  0x88   :  { %v368_v63 = vpop.permute.xlu1 %367 }
  0x89   :  { %v358_v0 = vpop.permute.xlu0 %357 }
  0x8c   :  { %v378_v1 = vpop.permute.xlu1 %377 }
  0x8d   :  { %v373_v2 = vpop.permute.xlu0 %372 }
  0x90   :  { %v832_v3 = vpop.permute.xlu1 %387 }
  0x91   :  { %v834_v4 = vpop.permute.xlu0 %382 }
  0x94   :  { %v398_v5 = vpop.permute.xlu1 %397 }
  0x95   :  { %v393_v6 = vpop.permute.xlu0 %392 }
  0x98   :  { %v408_v7 = vpop.permute.xlu1 %407 }
  0x99   :  { %v403_v8 = vpop.permute.xlu0 %402 }
  0x9c   :  { %v418_v26 = vpop.permute.xlu1 %417 }
  0x9d   :  { %v413_v27 = vpop.permute.xlu0 %412 }
  0xa0   :  { %v428_v50 = vpop.permute.xlu1 %427 }
  0xa3   :  { %v423_v53 = vpop.permute.xlu0 %422 }
  0xf5   :  { %v629_v9 = vpop.f32.mrb[0].mxu0  ;;  %v641_v10 = vpop.f32.mrb[0].mxu1 }
  0xf6   :  { %v204_v11 = vpop.f32.mrb[1].mxu0  ;;  %v244_v12 = vpop.f32.mrb[1].mxu1  ;;  %v431_v14 = vmul.f32 %v629_v9, %v358_v0  ;;  %v439_v15 = vmul.f32 %v641_v10, %v398_v5 }
  0xf7   :  { %v430_v16 = vmul.f32 %v353_v62, %v204_v11  ;;  %v438_v17 = vmul.f32 %v393_v6, %v244_v12 }
  0xf8   :  { %v454_v20 = vadd.f32 %v491_v13, %v431_v14  ;;  %v462_v21 = vadd.f32 %v491_v13, %v439_v15 }
  0xf9   :  { %v632_v18 = vpop.f32.mrb[2].mxu0  ;;  %v644_v19 = vpop.f32.mrb[2].mxu1  ;;  %v453_v24 = vadd.f32 %v491_v13, %v430_v16  ;;  %v461_v25 = vadd.f32 %v491_v13, %v438_v17 }
  0xfa   :  { %v214_v22 = vpop.f32.mrb[3].mxu0  ;;  %v254_v23 = vpop.f32.mrb[3].mxu1  ;;  %470 = vst [vmem:[%s893_s4 + $0x8] sm:$0xff] %v454_v20  ;;  %478 = vst [vmem:[%s893_s4 + $0x48] sm:$0xff] %v462_v21  ;;  %v433_v28 = vmul.f32 %v632_v18, %v368_v63  ;;  %v441_v29 = vmul.f32 %v644_v19, %v408_v7 }
  0xfb   :  { %469 = vst [vmem:[%s893_s4] sm:$0xff] %v453_v24  ;;  %477 = vst [vmem:[%s893_s4 + $0x40] sm:$0xff] %v461_v25  ;;  %v432_v30 = vmul.f32 %v363_v61, %v214_v22  ;;  %v440_v31 = vmul.f32 %v403_v8, %v254_v23 }
  0xfc   :  { %v456_v34 = vadd.f32 %v491_v13, %v433_v28  ;;  %v464_v35 = vadd.f32 %v491_v13, %v441_v29 }
  0xfd   :  { %v635_v32 = vpop.f32.mrb[4].mxu0  ;;  %v647_v33 = vpop.f32.mrb[4].mxu1  ;;  %v455_v38 = vadd.f32 %v491_v13, %v432_v30  ;;  %v463_v39 = vadd.f32 %v491_v13, %v440_v31 }
  0xfe   :  { %v224_v36 = vpop.f32.mrb[5].mxu0  ;;  %v264_v37 = vpop.f32.mrb[5].mxu1  ;;  %472 = vst [vmem:[%s893_s4 + $0x18] sm:$0xff] %v456_v34  ;;  %480 = vst [vmem:[%s893_s4 + $0x58] sm:$0xff] %v464_v35  ;;  %v435_v40 = vmul.f32 %v635_v32, %v378_v1  ;;  %v443_v41 = vmul.f32 %v647_v33, %v418_v26 }
  0xff   :  { %471 = vst [vmem:[%s893_s4 + $0x10] sm:$0xff] %v455_v38  ;;  %479 = vst [vmem:[%s893_s4 + $0x50] sm:$0xff] %v463_v39  ;;  %v434_v42 = vmul.f32 %v373_v2, %v224_v36  ;;  %v442_v43 = vmul.f32 %v413_v27, %v264_v37 }
 0x100   :  { %v458_v46 = vadd.f32 %v491_v13, %v435_v40  ;;  %v466_v47 = vadd.f32 %v491_v13, %v443_v41 }
 0x101   :  { %v638_v44 = vpop.f32.mrb[6].mxu0  ;;  %v650_v45 = vpop.f32.mrb[6].mxu1  ;;  %v457_v51 = vadd.f32 %v491_v13, %v434_v42  ;;  %v465_v52 = vadd.f32 %v491_v13, %v442_v43 }
 0x102   :  { %v234_v48 = vpop.f32.mrb[7].mxu0  ;;  %v274_v49 = vpop.f32.mrb[7].mxu1  ;;  %474 = vst [vmem:[%s893_s4 + $0x28] sm:$0xff] %v458_v46  ;;  %482 = vst [vmem:[%s893_s4 + $0x68] sm:$0xff] %v466_v47  ;;  %v437_v54 = vmul.f32 %v638_v44, %v832_v3  ;;  %v445_v55 = vmul.f32 %v650_v45, %v428_v50 }
 0x103   :  { %473 = vst [vmem:[%s893_s4 + $0x20] sm:$0xff] %v457_v51  ;;  %481 = vst [vmem:[%s893_s4 + $0x60] sm:$0xff] %v465_v52  ;;  %v436_v56 = vmul.f32 %v834_v4, %v234_v48  ;;  %v444_v57 = vmul.f32 %v423_v53, %v274_v49 }
 0x104   :  { %v460_v58 = vadd.f32 %v491_v13, %v437_v54  ;;  %v468_v59 = vadd.f32 %v491_v13, %v445_v55 }
 0x105   :  { %v459_v60 = vadd.f32 %v491_v13, %v436_v56  ;;  %v467_v61 = vadd.f32 %v491_v13, %v444_v57 }
 0x106   :  { %476 = vst [vmem:[%s893_s4 + $0x38] sm:$0xff] %v460_v58  ;;  %484 = vst [vmem:[%s893_s4 + $0x78] sm:$0xff] %v468_v59 }
 0x107   :  { %475 = vst [vmem:[%s893_s4 + $0x30] sm:$0xff] %v459_v60  ;;  %483 = vst [vmem:[%s893_s4 + $0x70] sm:$0xff] %v467_v61 }

// kernel: gcn_forward.2
= control target key start
LH: loop header
LB: loop body
LE: loop exit
PB: predicated region body
PF: predicated region fallthrough
CT: control target
= control target key end

     0   :  { %v1152_v2 = vmov 0   ;;  %s1422_s1 = inlined_call_operand.vmem [shape: bf16[128,128], index: 1, kind: input, shape index: {}]   ;;  %s1423_s0 = inlined_call_operand.vmem [shape: s8[128,128], index: 0, kind: input, shape index: {}]   ;;  %s1424_s2 = inlined_call_operand.vmem [shape: f32[128,1], index: 2, kind: input, shape index: {}]   ;;  %s1425_s4 = inlined_call_operand.vmem [shape: f32[128,128], index: 4, kind: input, shape index: {}]   ;;  %s1426_s3 = inlined_call_operand.vmem [shape: f32[1,128], index: 3, kind: input, shape index: {}]   ;;  %s1427_s5 = inlined_call_operand.vmem [shape: bf16[128,128], index: 5, kind: output, shape index: {}]  }
   0x1   :  { %v785_v0 = vld [vmem:[%s1422_s1] sm:$0xff]   ;;  %v856_v1 = vld [vmem:[%s1422_s1 + $0x8] sm:$0xff]   ;;  %1150 = vset.pattern.permute.xlu0 %v1152_v2  ;;  %1151 = vset.pattern.permute.xlu1 %v1152_v2  ;;  %v857_v5 = vld [vmem:[%s1422_s1 + $0x10] sm:$0xff]  }
   0x2   :  { %1079 = vmatprep.subr.bf16.mxu0 %v785_v0  ;;  %v1192_v3 = vld [vmem:[%s1423_s0] sm:$0xff]   ;;  %v323_v7 = vld [vmem:[%s1424_s2 + $0x10] sm:$0xff]  ;;  %v322_v9 = vld [vmem:[%s1424_s2 + $0x8] sm:$0xff] }
   0x3   :  { %1081 = vmatpush3.bf16.msra.mxu0 %v785_v0  ;;  %v872_v4 = vunpack.c.0.s8 %v1192_v3  ;;  %v321_v6 = vld [vmem:[%s1424_s2] sm:$0xff]  ;;  %365 = vperm.xlu1 %1151, %v323_v7   ;;  %v324_v10 = vld [vmem:[%s1424_s2 + $0x18] sm:$0xff]  ;;  %v489_v13 = vld [vmem:[%s1425_s4 + $0x8] sm:$0xff]  ;;  %v873_v38 = vunpack.c.1.s8 %v1192_v3  ;;  %v876_v40 = vunpack.c.2.s8 %v1192_v3  ;;  %v877_v47 = vunpack.c.3.s8 %v1192_v3 }
   0x4   :  { %1083 = vmatprep.subr.bf16.mxu0 %v856_v1  ;;  %355 = vperm.xlu0 %1150, %v321_v6   ;;  %v858_v11 = vld [vmem:[%s1422_s1 + $0x18] sm:$0xff]   ;;  %v488_v12 = vld [vmem:[%s1425_s4] sm:$0xff]  ;;  %v326_v15 = vld [vmem:[%s1424_s2 + $0x28] sm:$0xff] }
   0x5   :  { %v72_v8 = vcvt.s32.f32 %v872_v4  ;;  %v325_v14 = vld [vmem:[%s1424_s2 + $0x20] sm:$0xff]  ;;  %v1110_v16 = vpack.c.bf16 %v489_v13, %v488_v12  ;;  %v490_v18 = vld [vmem:[%s1425_s4 + $0x10] sm:$0xff]  ;;  %v491_v19 = vld [vmem:[%s1425_s4 + $0x18] sm:$0xff]  ;;  %v73_v46 = vcvt.s32.f32 %v873_v38  ;;  %v74_v49 = vcvt.s32.f32 %v876_v40 }
   0x6   :  { %v859_v17 = vld [vmem:[%s1422_s1 + $0x20] sm:$0xff]   ;;  %v1114_v20 = vpack.c.bf16 %v491_v19, %v490_v18  ;;  %v327_v21 = vld [vmem:[%s1424_s2 + $0x30] sm:$0xff]  ;;  %v328_v22 = vld [vmem:[%s1424_s2 + $0x38] sm:$0xff]  ;;  %v75_v53 = vcvt.s32.f32 %v877_v47 }
   0x7   :  { %1085 = vmatpush3.bf16.msra.mxu0 %v856_v1  ;;  %998 = vmatprep.mubr.f32.mxu0 %v72_v8  ;;  %v860_v23 = vld [vmem:[%s1422_s1 + $0x28] sm:$0xff]   ;;  %v492_v24 = vld [vmem:[%s1425_s4 + $0x20] sm:$0xff]  ;;  %v861_v29 = vld [vmem:[%s1422_s1 + $0x30] sm:$0xff]  }
   0x8   :  { %1087 = vmatprep.subr.bf16.mxu0 %v857_v5  ;;  %360 = vperm.xlu0 %1150, %v322_v9   ;;  %v493_v25 = vld [vmem:[%s1425_s4 + $0x28] sm:$0xff]  ;;  %v329_v27 = vld [vmem:[%s1424_s2 + $0x40] sm:$0xff]  ;;  %v494_v30 = vld [vmem:[%s1425_s4 + $0x30] sm:$0xff] }
   0x9   :  { %370 = vperm.xlu1 %1151, %v324_v10   ;;  %1111 = vmatprep.subr.bf16.mxu1 %v1110_v16  ;;  %v1118_v26 = vpack.c.bf16 %v493_v25, %v492_v24  ;;  %v330_v28 = vld [vmem:[%s1424_s2 + $0x48] sm:$0xff]  ;;  %v495_v31 = vld [vmem:[%s1425_s4 + $0x38] sm:$0xff]  ;;  %v331_v33 = vld [vmem:[%s1424_s2 + $0x50] sm:$0xff] }
   0xa   :  { %1113 = vmatpush3.bf16.msra.mxu1 %v1110_v16  ;;  %v1122_v32 = vpack.c.bf16 %v495_v31, %v494_v30  ;;  %v332_v34 = vld [vmem:[%s1424_s2 + $0x58] sm:$0xff]  ;;  %v496_v36 = vld [vmem:[%s1425_s4 + $0x40] sm:$0xff]  ;;  %v497_v37 = vld [vmem:[%s1425_s4 + $0x48] sm:$0xff] }
   0xb   :  { %1089 = vmatpush3.bf16.msra.mxu0 %v857_v5  ;;  %1115 = vmatprep.subr.bf16.mxu1 %v1114_v20  ;;  %v862_v35 = vld [vmem:[%s1422_s1 + $0x38] sm:$0xff]   ;;  %v1126_v39 = vpack.c.bf16 %v497_v37, %v496_v36  ;;  %v333_v41 = vld [vmem:[%s1424_s2 + $0x60] sm:$0xff]  ;;  %v334_v42 = vld [vmem:[%s1424_s2 + $0x68] sm:$0xff] }
   0xc   :  { %1091 = vmatprep.subr.bf16.mxu0 %v858_v11  ;;  %375 = vperm.xlu0 %1150, %v325_v14   ;;  %v1143_v43 = vld [vmem:[%s1423_s0 + $0x8] sm:$0xff]   ;;  %v498_v44 = vld [vmem:[%s1425_s4 + $0x50] sm:$0xff]  ;;  %v499_v45 = vld [vmem:[%s1425_s4 + $0x58] sm:$0xff] }
   0xd   :  { %380 = vperm.xlu1 %1151, %v326_v15   ;;  %v1130_v48 = vpack.c.bf16 %v499_v45, %v498_v44  ;;  %v880_v50 = vunpack.c.0.s8 %v1143_v43  ;;  %v335_v51 = vld [vmem:[%s1424_s2 + $0x70] sm:$0xff]  ;;  %v336_v52 = vld [vmem:[%s1424_s2 + $0x78] sm:$0xff]  ;;  %v881_v54 = vunpack.c.1.s8 %v1143_v43  ;;  %v884_v56 = vunpack.c.2.s8 %v1143_v43  ;;  %v500_v15 = vld [vmem:[%s1425_s4 + $0x60] sm:$0xff] }
   0xe   :  { %1117 = vmatpush3.bf16.msra.mxu1 %v1114_v20  ;;  %v1145_v57 = vld [vmem:[%s1423_s0 + $0x10] sm:$0xff]   ;;  %v885_v59 = vunpack.c.3.s8 %v1143_v43  ;;  %v1147_v2 = vld [vmem:[%s1423_s0 + $0x18] sm:$0xff]   ;;  %v501_v16 = vld [vmem:[%s1425_s4 + $0x68] sm:$0xff] }
   0xf   :  { %1093 = vmatpush3.bf16.msra.mxu0 %v858_v11  ;;  %1119 = vmatprep.subr.bf16.mxu1 %v1118_v26  ;;  %v76_v55 = vcvt.s32.f32 %v880_v50  ;;  %v77_v58 = vcvt.s32.f32 %v881_v54  ;;  %v78_v60 = vcvt.s32.f32 %v884_v56  ;;  %v888_v61 = vunpack.c.0.s8 %v1145_v57  ;;  %v502_v18 = vld [vmem:[%s1425_s4 + $0x70] sm:$0xff]  ;;  %v503_v19 = vld [vmem:[%s1425_s4 + $0x78] sm:$0xff] }
  0x10   :  { %1095 = vmatprep.subr.bf16.mxu0 %v859_v17  ;;  %385 = vperm.xlu0 %1150, %v327_v21   ;;  %v79_v62 = vcvt.s32.f32 %v885_v59  ;;  %v889_v63 = vunpack.c.1.s8 %v1145_v57  ;;  %v892_v1 = vunpack.c.2.s8 %v1145_v57  ;;  %v893_v4 = vunpack.c.3.s8 %v1145_v57 }
  0x11   :  { %390 = vperm.xlu1 %1151, %v328_v22   ;;  %v80_v0 = vcvt.s32.f32 %v888_v61  ;;  %v896_v6 = vunpack.c.0.s8 %v1147_v2  ;;  %v897_v8 = vunpack.c.1.s8 %v1147_v2  ;;  %v900_v10 = vunpack.c.2.s8 %v1147_v2 }
  0x12   :  { %1121 = vmatpush3.bf16.msra.mxu1 %v1118_v26  ;;  %v81_v3 = vcvt.s32.f32 %v889_v63  ;;  %v82_v5 = vcvt.s32.f32 %v892_v1  ;;  %v83_v7 = vcvt.s32.f32 %v893_v4  ;;  %v901_v12 = vunpack.c.3.s8 %v1147_v2 }
  0x13   :  { %1097 = vmatpush3.bf16.msra.mxu0 %v859_v17  ;;  %1123 = vmatprep.subr.bf16.mxu1 %v1122_v32  ;;  %v84_v9 = vcvt.s32.f32 %v896_v6  ;;  %v85_v11 = vcvt.s32.f32 %v897_v8  ;;  %v86_v13 = vcvt.s32.f32 %v900_v10  ;;  %v1134_v17 = vpack.c.bf16 %v501_v16, %v500_v15 }
  0x14   :  { %1099 = vmatprep.subr.bf16.mxu0 %v860_v23  ;;  %395 = vperm.xlu0 %1150, %v329_v27   ;;  %v87_v14 = vcvt.s32.f32 %v901_v12  ;;  %v1138_v20 = vpack.c.bf16 %v503_v19, %v502_v18 }
  0x15   :  { %400 = vperm.xlu1 %1151, %v330_v28   ;;  %v1336_v28 = vld [vmem:[%s1426_s3] ss:$0 sm:$0xff] }
  0x16   :  { %1125 = vmatpush3.bf16.msra.mxu1 %v1122_v32 }
  0x17   :  { %1101 = vmatpush3.bf16.msra.mxu0 %v860_v23  ;;  %1127 = vmatprep.subr.bf16.mxu1 %v1126_v39 }
  0x18   :  { %1103 = vmatprep.subr.bf16.mxu0 %v861_v29  ;;  %405 = vperm.xlu0 %1150, %v331_v33  }
  0x19   :  { %410 = vperm.xlu1 %1151, %v332_v34  }
  0x1a   :  { %1129 = vmatpush3.bf16.msra.mxu1 %v1126_v39 }
  0x1b   :  { %1105 = vmatpush3.bf16.msra.mxu0 %v861_v29  ;;  %1131 = vmatprep.subr.bf16.mxu1 %v1130_v48 }
  0x1c   :  { %1107 = vmatprep.subr.bf16.mxu0 %v862_v35  ;;  %415 = vperm.xlu0 %1150, %v333_v41  }
  0x1d   :  { %420 = vperm.xlu1 %1151, %v334_v42  }
  0x1e   :  { %1133 = vmatpush3.bf16.msra.mxu1 %v1130_v48 }
  0x1f   :  { %1109 = vmatpush3.bf16.msra.mxu0 %v862_v35  ;;  %1135 = vmatprep.subr.bf16.mxu1 %v1134_v17 }
  0x20   :  { %425 = vperm.xlu0 %1150, %v335_v51  }
  0x21   :  { %430 = vperm.xlu1 %1151, %v336_v52  }
  0x22   :  { %999 = vmatmul.mubr.f32.vlgmr.msra.gmra.mrb[0].mxu0 %v73_v46  ;;  %1137 = vmatpush3.bf16.msra.mxu1 %v1134_v17 }
  0x23   :  { %1001 = vmatprep.mubr.f32.mxu0 %v74_v49  ;;  %1139 = vmatprep.subr.bf16.mxu1 %v1138_v20 }
  0x26   :  { %1002 = vmatmul.mubr.f32.gmra.mrb[2].mxu0 %v75_v53  ;;  %1141 = vmatpush3.bf16.msra.mxu1 %v1138_v20 }
  0x27   :  { %1004 = vmatprep.mubr.f32.mxu0 %v76_v55 }
  0x2a   :  { %1005 = vmatmul.mubr.f32.gmra.mrb[4].mxu0 %v77_v58 }
  0x2b   :  { %1007 = vmatprep.mubr.f32.mxu0 %v78_v60 }
  0x2e   :  { %1008 = vmatmul.mubr.f32.gmra.mrb[6].mxu0 %v79_v62 }
  0x2f   :  { %1010 = vmatprep.mubr.f32.mxu0 %v80_v0 }
  0x32   :  { %1011 = vmatmul.mubr.f32.gmra.mrb[8].mxu0 %v81_v3 }
  0x33   :  { %1013 = vmatprep.mubr.f32.mxu0 %v82_v5 }
  0x36   :  { %1014 = vmatmul.mubr.f32.gmra.mrb[10].mxu0 %v83_v7 }
  0x37   :  { %1016 = vmatprep.mubr.f32.mxu0 %v84_v9 }
  0x3a   :  { %1017 = vmatmul.mubr.f32.gmra.mrb[12].mxu0 %v85_v11 }
  0x3b   :  { %1019 = vmatprep.mubr.f32.mxu0 %v86_v13 }
  0x3e   :  { %1020 = vmatmul.mubr.f32.gmra.mrb[14].mxu0 %v87_v14 }
  0x82   :  { %v1321_v21 = vpop.permute.xlu1 %365 }
  0x83   :  { %v1323_v22 = vpop.permute.xlu0 %355 }
  0x87   :  { %v1327_v24 = vpop.permute.xlu0 %360 }
  0x88   :  { %v1325_v23 = vpop.permute.xlu1 %370 }
  0x8b   :  { %v1331_v26 = vpop.permute.xlu0 %375 }
  0x8c   :  { %v1329_v25 = vpop.permute.xlu1 %380 }
  0x8f   :  { %v1344_v36 = vpop.permute.xlu0 %385 }
  0x90   :  { %v1341_v33 = vpop.permute.xlu1 %390 }
  0x93   :  { %v1354_v50 = vpop.permute.xlu0 %395 }
  0x94   :  { %v1351_v47 = vpop.permute.xlu1 %400 }
  0x97   :  { %v1364_v0 = vpop.permute.xlu0 %405 }
  0x98   :  { %v1361_v61 = vpop.permute.xlu1 %410 }
  0x9b   :  { %v1374_v14 = vpop.permute.xlu0 %415 }
  0x9c   :  { %v1371_v11 = vpop.permute.xlu1 %420 }
  0xf5   :  { %v1000_v27 = vpop.f32.mrb[0].mxu0 }
  0xf6   :  { %v434_v29 = vmul.f32 %v1000_v27, %v1327_v24  ;;  %v207_v30 = vpop.f32.mrb[1].mxu0 }
  0xf7   :  { %v433_v31 = vmul.f32 %v1323_v22, %v207_v30 }
  0xf8   :  { %v457_v32 = vadd.f32 %v1336_v28, %v434_v29 }
  0xf9   :  { %v1003_v34 = vpop.f32.mrb[2].mxu0  ;;  %v456_v35 = vadd.f32 %v1336_v28, %v433_v31 }
  0xfa   :  { %v436_v37 = vmul.f32 %v1003_v34, %v1325_v23  ;;  %v217_v38 = vpop.f32.mrb[3].mxu0  ;;  %v473_v41 = vmax.f32 %v457_v32, 0.0  ;;  %v431_v32 = vpop.permute.xlu1 %430 }
  0xfb   :  { %v435_v39 = vmul.f32 %v1321_v21, %v217_v38  ;;  %v472_v40 = vmax.f32 %v456_v35, 0.0 }
  0xfc   :  { %v459_v42 = vadd.f32 %v1336_v28, %v436_v37  ;;  %v426_v37 = vpop.permute.xlu0 %425 }
  0xfd   :  { %v458_v43 = vadd.f32 %v1336_v28, %v435_v39  ;;  %v1006_v44 = vpop.f32.mrb[4].mxu0  ;;  %1054 = vmatprep.mubr.f32.mxu1 %v472_v40 }
  0xfe   :  { %v438_v45 = vmul.f32 %v1006_v44, %v1329_v25  ;;  %v227_v46 = vpop.f32.mrb[5].mxu0  ;;  %1055 = vmatmul.mubr.f32.vlgmr.msra.gmra.mrb[0].mxu1 %v473_v41  ;;  %v475_v51 = vmax.f32 %v459_v42, 0.0 }
  0xff   :  { %v474_v48 = vmax.f32 %v458_v43, 0.0  ;;  %v437_v49 = vmul.f32 %v1331_v26, %v227_v46 }
 0x100   :  { %v461_v52 = vadd.f32 %v1336_v28, %v438_v45 }
 0x101   :  { %v460_v53 = vadd.f32 %v1336_v28, %v437_v49  ;;  %v1009_v54 = vpop.f32.mrb[6].mxu0  ;;  %1057 = vmatprep.mubr.f32.mxu1 %v474_v48 }
 0x102   :  { %v440_v55 = vmul.f32 %v1009_v54, %v1341_v33  ;;  %v237_v56 = vpop.f32.mrb[7].mxu0  ;;  %1058 = vmatmul.mubr.f32.gmra.mrb[2].mxu1 %v475_v51  ;;  %v477_v59 = vmax.f32 %v461_v52, 0.0 }
 0x103   :  { %v476_v57 = vmax.f32 %v460_v53, 0.0  ;;  %v439_v58 = vmul.f32 %v1344_v36, %v237_v56 }
 0x104   :  { %v463_v60 = vadd.f32 %v1336_v28, %v440_v55 }
 0x105   :  { %v462_v62 = vadd.f32 %v1336_v28, %v439_v58  ;;  %v1012_v63 = vpop.f32.mrb[8].mxu0  ;;  %1060 = vmatprep.mubr.f32.mxu1 %v476_v57 }
 0x106   :  { %v442_v1 = vmul.f32 %v1012_v63, %v1351_v47  ;;  %v247_v2 = vpop.f32.mrb[9].mxu0  ;;  %1061 = vmatmul.mubr.f32.gmra.mrb[4].mxu1 %v477_v59  ;;  %v479_v5 = vmax.f32 %v463_v60, 0.0 }
 0x107   :  { %v478_v3 = vmax.f32 %v462_v62, 0.0  ;;  %v441_v4 = vmul.f32 %v1354_v50, %v247_v2 }
 0x108   :  { %v465_v6 = vadd.f32 %v1336_v28, %v442_v1 }
 0x109   :  { %v464_v7 = vadd.f32 %v1336_v28, %v441_v4  ;;  %v1015_v8 = vpop.f32.mrb[10].mxu0  ;;  %1063 = vmatprep.mubr.f32.mxu1 %v478_v3 }
 0x10a   :  { %v444_v9 = vmul.f32 %v1015_v8, %v1361_v61  ;;  %v257_v10 = vpop.f32.mrb[11].mxu0  ;;  %1064 = vmatmul.mubr.f32.gmra.mrb[6].mxu1 %v479_v5  ;;  %v481_v15 = vmax.f32 %v465_v6, 0.0 }
 0x10b   :  { %v480_v12 = vmax.f32 %v464_v7, 0.0  ;;  %v443_v13 = vmul.f32 %v1364_v0, %v257_v10 }
 0x10c   :  { %v467_v16 = vadd.f32 %v1336_v28, %v444_v9 }
 0x10d   :  { %v466_v17 = vadd.f32 %v1336_v28, %v443_v13  ;;  %v1018_v18 = vpop.f32.mrb[12].mxu0  ;;  %1066 = vmatprep.mubr.f32.mxu1 %v480_v12 }
 0x10e   :  { %v446_v19 = vmul.f32 %v1018_v18, %v1371_v11  ;;  %v267_v20 = vpop.f32.mrb[13].mxu0  ;;  %1067 = vmatmul.mubr.f32.gmra.mrb[8].mxu1 %v481_v15  ;;  %v483_v30 = vmax.f32 %v467_v16, 0.0 }
 0x10f   :  { %v482_v27 = vmax.f32 %v466_v17, 0.0  ;;  %v445_v29 = vmul.f32 %v1374_v14, %v267_v20 }
 0x110   :  { %v469_v31 = vadd.f32 %v1336_v28, %v446_v19 }
 0x111   :  { %v468_v34 = vadd.f32 %v1336_v28, %v445_v29  ;;  %v1021_v35 = vpop.f32.mrb[14].mxu0  ;;  %1069 = vmatprep.mubr.f32.mxu1 %v482_v27 }
 0x112   :  { %v448_v38 = vmul.f32 %v1021_v35, %v431_v32  ;;  %v277_v39 = vpop.f32.mrb[15].mxu0  ;;  %1070 = vmatmul.mubr.f32.gmra.mrb[10].mxu1 %v483_v30  ;;  %v485_v42 = vmax.f32 %v469_v31, 0.0 }
 0x113   :  { %v484_v40 = vmax.f32 %v468_v34, 0.0  ;;  %v447_v41 = vmul.f32 %v426_v37, %v277_v39 }
 0x114   :  { %v471_v43 = vadd.f32 %v1336_v28, %v448_v38 }
 0x115   :  { %v470_v44 = vadd.f32 %v1336_v28, %v447_v41  ;;  %1072 = vmatprep.mubr.f32.mxu1 %v484_v40 }
 0x116   :  { %1073 = vmatmul.mubr.f32.gmra.mrb[12].mxu1 %v485_v42  ;;  %v487_v46 = vmax.f32 %v471_v43, 0.0 }
 0x117   :  { %v486_v45 = vmax.f32 %v470_v44, 0.0 }
 0x119   :  { %1075 = vmatprep.mubr.f32.mxu1 %v486_v45 }
 0x11a   :  { %1076 = vmatmul.mubr.f32.gmra.mrb[14].mxu1 %v487_v46 }
 0x1d1   :  { %v1056_v48 = vpop.f32.mrb[0].mxu1 }
 0x1d2   :  { %v650_v49 = vmul.f32 %v1056_v48, %v1327_v24  ;;  %v570_v51 = vpop.f32.mrb[1].mxu1 }
 0x1d3   :  { %v649_v52 = vmul.f32 %v570_v51, %v1323_v22 }
 0x1d5   :  { %v819_v53 = vpack.c.bf16 %v650_v49, %v649_v52  ;;  %v1059_v54 = vpop.f32.mrb[2].mxu1 }
 0x1d6   :  { %v652_v55 = vmul.f32 %v1059_v54, %v1325_v23  ;;  %v580_v56 = vpop.f32.mrb[3].mxu1 }
 0x1d7   :  { %820 = vst [vmem:[%s1427_s5] sm:$0xff] %v819_v53   ;;  %v651_v28 = vmul.f32 %v580_v56, %v1321_v21 }
 0x1d9   :  { %v824_v57 = vpack.c.bf16 %v652_v55, %v651_v28  ;;  %v1062_v58 = vpop.f32.mrb[4].mxu1 }
 0x1da   :  { %v654_v59 = vmul.f32 %v1062_v58, %v1329_v25  ;;  %v590_v60 = vpop.f32.mrb[5].mxu1 }
 0x1db   :  { %863 = vst [vmem:[%s1427_s5 + $0x8] sm:$0xff] %v824_v57   ;;  %v653_v22 = vmul.f32 %v590_v60, %v1331_v26 }
 0x1dd   :  { %v829_v24 = vpack.c.bf16 %v654_v59, %v653_v22  ;;  %v1065_v23 = vpop.f32.mrb[6].mxu1 }
 0x1de   :  { %v656_v62 = vmul.f32 %v1065_v23, %v1341_v33  ;;  %v600_v63 = vpop.f32.mrb[7].mxu1 }
 0x1df   :  { %864 = vst [vmem:[%s1427_s5 + $0x10] sm:$0xff] %v829_v24   ;;  %v655_v21 = vmul.f32 %v600_v63, %v1344_v36 }
 0x1e1   :  { %v834_v1 = vpack.c.bf16 %v656_v62, %v655_v21  ;;  %v1068_v25 = vpop.f32.mrb[8].mxu1 }
 0x1e2   :  { %v658_v2 = vmul.f32 %v1068_v25, %v1351_v47  ;;  %v610_v3 = vpop.f32.mrb[9].mxu1 }
 0x1e3   :  { %865 = vst [vmem:[%s1427_s5 + $0x18] sm:$0xff] %v834_v1   ;;  %v657_v26 = vmul.f32 %v610_v3, %v1354_v50 }
 0x1e5   :  { %v839_v4 = vpack.c.bf16 %v658_v2, %v657_v26  ;;  %v1071_v33 = vpop.f32.mrb[10].mxu1 }
 0x1e6   :  { %v660_v5 = vmul.f32 %v1071_v33, %v1361_v61  ;;  %v620_v6 = vpop.f32.mrb[11].mxu1 }
 0x1e7   :  { %866 = vst [vmem:[%s1427_s5 + $0x20] sm:$0xff] %v839_v4   ;;  %v659_v36 = vmul.f32 %v620_v6, %v1364_v0 }
 0x1e9   :  { %v844_v7 = vpack.c.bf16 %v660_v5, %v659_v36  ;;  %v1074_v47 = vpop.f32.mrb[12].mxu1 }
 0x1ea   :  { %v662_v8 = vmul.f32 %v1074_v47, %v1371_v11  ;;  %v630_v9 = vpop.f32.mrb[13].mxu1 }
 0x1eb   :  { %867 = vst [vmem:[%s1427_s5 + $0x28] sm:$0xff] %v844_v7   ;;  %v661_v50 = vmul.f32 %v630_v9, %v1374_v14 }
 0x1ed   :  { %v849_v10 = vpack.c.bf16 %v662_v8, %v661_v50  ;;  %v1077_v61 = vpop.f32.mrb[14].mxu1 }
 0x1ee   :  { %v664_v12 = vmul.f32 %v1077_v61, %v431_v32  ;;  %v640_v13 = vpop.f32.mrb[15].mxu1 }
 0x1ef   :  { %868 = vst [vmem:[%s1427_s5 + $0x30] sm:$0xff] %v849_v10   ;;  %v663_v0 = vmul.f32 %v640_v13, %v426_v37 }
 0x1f1   :  { %v854_v15 = vpack.c.bf16 %v664_v12, %v663_v0 }
 0x1f3   :  { %869 = vst [vmem:[%s1427_s5 + $0x38] sm:$0xff] %v854_v15  }

</bundles_post_ra>
